<compile_context>
chip_gen: v5e
topology: v5e:2x2
jax: 0.10.0
libtpu: 0.0.40
codegen_flags: <defaults>
</compile_context>

<pallas_src>
import jax
import jax.numpy as jnp
from jax.experimental import pallas as pl
from jax.experimental.pallas import tpu as pltpu


def se_kernel(x_ref, w1t_ref, b1_ref, w2t_ref, b2_ref, o_ref):
    # x_ref / o_ref: (bb, C, HW)  NCHW-native: HW on lanes, C on sublanes.
    # w1t_ref:       (C, Ch)      already pre-scaled by 1/HW
    # b1_ref:        (1, Ch)
    # w2t_ref:       (Ch, C)
    # b2_ref:        (1, C)
    # Global average pool: cross-lane sum over HW; 1/HW is folded into w1t.
    # Cast before the sum so a bf16 x path accumulates in f32 (identity for f32 inputs).
    pooled = jnp.sum(x_ref[...].astype(jnp.float32), axis=-1)              # (bb, C)
    h = jnp.dot(pooled, w1t_ref[...],
                preferred_element_type=jnp.float32) + b1_ref[...]          # (bb, Ch)
    h = jnp.maximum(h, 0.0)                                                # ReLU
    y = jnp.dot(h, w2t_ref[...],
                preferred_element_type=jnp.float32) + b2_ref[...]          # (bb, C)
    y = jax.nn.sigmoid(y)                                                  # Sigmoid (tiny)
    # Channel-wise rescale: cross-lane broadcast of the per-channel scale across HW.
    # x_ref is re-read here (second VMEM load) instead of holding one huge live value.
    o_ref[...] = x_ref[...] * y[:, :, None].astype(o_ref.dtype)


def se_layer(x, w1, b1, w2, b2):
    """x: (B, C, H, W); weights follow torch.nn.Linear conventions:
       w1: (C//r, C), b1: (C//r,), w2: (C, C//r), b2: (C,)."""
    B, C, H, W = x.shape
    Ch = w1.shape[0]
    HW = H * W

    # ---- NCHW-native view: contiguous reshape only, no HBM relayout.
    x3 = x.reshape(B, C, HW)

    # ---- pre-transpose weights; fold AdaptiveAvgPool2d's 1/HW into the FC1 weight.
    w1t = (w1.T * (1.0 / HW)).astype(jnp.float32)      # (C, Ch)
    w2t = w2.T.astype(jnp.float32)                     # (Ch, C)
    b1_2d = b1.reshape(1, Ch).astype(jnp.float32)
    b2_2d = b2.reshape(1, C).astype(jnp.float32)

    # ---- generation-aware VMEM budget.
    itemsize = jnp.dtype(x.dtype).itemsize
    try:
        vmem_cap = int(pltpu.get_tpu_info().vmem_capacity_bytes)   # 64 MiB v7x, 128 MiB v5e/v6e
    except Exception:
        vmem_cap = 64 << 20                                        # conservative: v7x
    weights_bytes = (C * Ch + Ch + Ch * C + C) * 4
    headroom = 2 << 20
    vmem_limit_cap = int(min(max(vmem_cap * 3 // 4, 16 << 20), 112 << 20))
    x_block_budget = vmem_limit_cap - 2 * weights_bytes - headroom  # 2x in + 2x out x buffers

    # ---- batch block: largest that fits the budget, but always leave >=2 grid steps so
    #      both v7x TensorCores get work (dimension_semantics=("parallel",)).
    bytes_per_batch_row = C * HW * itemsize
    bb_vmem = max(1, x_block_budget // (4 * bytes_per_batch_row))
    bb_cap = -(-B // 2) if B >= 2 else 1                            # ceil(B/2)
    bb = int(max(1, min(B, bb_vmem, bb_cap)))
    grid = (pl.cdiv(B, bb),)   # ragged last block OK: batch rows are independent and
                               # Pallas masks out-of-bounds rows on writeback.

    vmem_needed = (4 * bb * bytes_per_batch_row    # x in+out, double-buffered
                   + 4 * weights_bytes             # weights/biases (worst case double-buffered)
                   + headroom)
    vmem_limit = int(min(max(vmem_needed, 16 << 20), vmem_limit_cap))

    x_spec = pl.BlockSpec((bb, C, HW), lambda i: (i, 0, 0))

    def build(single_buffer_weights):
        if single_buffer_weights:
            def const_spec(shape):
                return pl.BlockSpec(shape, lambda i: (0,) * len(shape),
                                    pipeline_mode=pl.Buffered(1))
        else:
            def const_spec(shape):
                return pl.BlockSpec(shape, lambda i: (0,) * len(shape))
        return pl.pallas_call(
            se_kernel,
            out_shape=jax.ShapeDtypeStruct((B, C, HW), x.dtype),
            grid_spec=pltpu.PrefetchScalarGridSpec(
                num_scalar_prefetch=0,
                grid=grid,
                in_specs=[
                    x_spec,
                    const_spec((C, Ch)),
                    const_spec((1, Ch)),
                    const_spec((Ch, C)),
                    const_spec((1, C)),
                ],
                out_specs=pl.BlockSpec((bb, C, HW), lambda i: (i, 0, 0)),
            ),
            compiler_params=pltpu.CompilerParams(
                dimension_semantics=("parallel",),
                vmem_limit_bytes=vmem_limit,
            ),
        )

    try:
        out3 = build(True)(x3, w1t, b1_2d, w2t, b2_2d)
    except Exception:
        # pl.Buffered(1) rejected on this jax version -> fall back to default double-buffering.
        out3 = build(False)(x3, w1t, b1_2d, w2t, b2_2d)

    # ---- contiguous reshape back to NCHW (free).
    return out3.reshape(B, C, H, W)


def _ref_se_layer(x, w1, b1, w2, b2):
    # Pure-JAX reference matching the PyTorch forward exactly.
    y = jnp.mean(x, axis=(2, 3))                 # (B, C)  == AdaptiveAvgPool2d(1)
    y = jnp.maximum(y @ w1.T + b1, 0.0)          # FC1 + ReLU
    y = jax.nn.sigmoid(y @ w2.T + b2)            # FC2 + Sigmoid
    return x * y[:, :, None, None]


if __name__ == "__main__":
    # Small shapes consistent with SELayer(channel=32, reduction=16); H*W=256 keeps the
    # lane (last) dimension of the NCHW-native blocks a multiple of 128.
    B, C, H, W = 2, 32, 16, 16
    reduction = 16
    Ch = C // reduction  # 2

    key = jax.random.PRNGKey(0)
    kx, k1, k2, k3, k4 = jax.random.split(key, 5)

    x = jax.random.normal(kx, (B, C, H, W), dtype=jnp.float32)

    # Deterministic init mimicking torch.nn.Linear default (uniform +/- 1/sqrt(fan_in)).
    bound1 = 1.0 / jnp.sqrt(jnp.float32(C))
    w1 = jax.random.uniform(k1, (Ch, C), jnp.float32, -bound1, bound1)
    b1 = jax.random.uniform(k2, (Ch,), jnp.float32, -bound1, bound1)
    bound2 = 1.0 / jnp.sqrt(jnp.float32(Ch))
    w2 = jax.random.uniform(k3, (C, Ch), jnp.float32, -bound2, bound2)
    b2 = jax.random.uniform(k4, (C,), jnp.float32, -bound2, bound2)

    out = se_layer(x, w1, b1, w2, b2)
    out = jax.block_until_ready(out)

    ref = _ref_se_layer(x, w1, b1, w2, b2)
    assert out.shape == (B, C, H, W)
    assert jnp.allclose(out, ref, atol=1e-5, rtol=1e-5), "mismatch vs reference"

    print("KERNEL_OK")
</pallas_src>

<mosaic_0001>
module attributes {stable_mosaic.version = 11 : i64} {
  func.func @se_kernel(%arg0: i32, %arg1: memref<1x32x256xf32, #tpu.memory_space<vmem>>, %arg2: memref<32x2xf32, #tpu.memory_space<vmem>>, %arg3: memref<1x2xf32, #tpu.memory_space<vmem>>, %arg4: memref<2x32xf32, #tpu.memory_space<vmem>>, %arg5: memref<1x32xf32, #tpu.memory_space<vmem>>, %arg6: memref<1x32x256xf32, #tpu.memory_space<vmem>>) attributes {dimension_semantics = [#tpu.dimension_semantics<parallel>], iteration_bounds = array<i64: 2>, scalar_prefetch = 0 : i64, scratch_operands = 0 : i64, tpu.core_type = #tpu.core_type<tc>, window_params = [{transform_indices = @transform_0, window_bounds = array<i64: 1, 32, 256>}, {pipeline_mode = #tpu.pipeline_mode<synchronous>, transform_indices = @transform_1, window_bounds = array<i64: 32, 2>}, {pipeline_mode = #tpu.pipeline_mode<synchronous>, transform_indices = @transform_2, window_bounds = array<i64: 1, 2>}, {pipeline_mode = #tpu.pipeline_mode<synchronous>, transform_indices = @transform_3, window_bounds = array<i64: 2, 32>}, {pipeline_mode = #tpu.pipeline_mode<synchronous>, transform_indices = @transform_4, window_bounds = array<i64: 1, 32>}, {transform_indices = @transform_5, window_bounds = array<i64: 1, 32, 256>}]} {
    %c0 = arith.constant 0 : index
    %c0_0 = arith.constant 0 : index
    %c0_1 = arith.constant 0 : index
    %0 = vector.load %arg1[%c0, %c0_0, %c0_1] : memref<1x32x256xf32, #tpu.memory_space<vmem>>, vector<1x32x256xf32>
    %cst = arith.constant dense<0.000000e+00> : vector<1x32xf32>
    %1 = vector.multi_reduction <add>, %0, %cst [2] : vector<1x32x256xf32> to vector<1x32xf32>
    %c0_2 = arith.constant 0 : index
    %c0_3 = arith.constant 0 : index
    %2 = vector.load %arg2[%c0_2, %c0_3] : memref<32x2xf32, #tpu.memory_space<vmem>>, vector<32x2xf32>
    %cst_4 = arith.constant dense<0.000000e+00> : vector<1x2xf32>
    %3 = tpu.matmul %1, %2, %cst_4 {dimension_numbers = #tpu.dot_dimension_numbers<[1], [0], [0], [1], [0, 0, 1, 1], [], []>} : vector<1x32xf32>, vector<32x2xf32>, vector<1x2xf32> -> vector<1x2xf32>
    %c0_5 = arith.constant 0 : index
    %c0_6 = arith.constant 0 : index
    %4 = vector.load %arg3[%c0_5, %c0_6] : memref<1x2xf32, #tpu.memory_space<vmem>>, vector<1x2xf32>
    %5 = arith.addf %3, %4 : vector<1x2xf32>
    %cst_7 = arith.constant 0.000000e+00 : f32
    %6 = vector.broadcast %cst_7 : f32 to vector<1x2xf32>
    %7 = arith.maximumf %5, %6 : vector<1x2xf32>
    %c0_8 = arith.constant 0 : index
    %c0_9 = arith.constant 0 : index
    %8 = vector.load %arg4[%c0_8, %c0_9] : memref<2x32xf32, #tpu.memory_space<vmem>>, vector<2x32xf32>
    %cst_10 = arith.constant dense<0.000000e+00> : vector<1x32xf32>
    %9 = tpu.matmul %7, %8, %cst_10 {dimension_numbers = #tpu.dot_dimension_numbers<[1], [0], [0], [1], [0, 0, 1, 1], [], []>} : vector<1x2xf32>, vector<2x32xf32>, vector<1x32xf32> -> vector<1x32xf32>
    %c0_11 = arith.constant 0 : index
    %c0_12 = arith.constant 0 : index
    %10 = vector.load %arg5[%c0_11, %c0_12] : memref<1x32xf32, #tpu.memory_space<vmem>>, vector<1x32xf32>
    %11 = arith.addf %9, %10 : vector<1x32xf32>
    %12 = arith.negf %11 : vector<1x32xf32>
    %13 = math.exp %12 : vector<1x32xf32>
    %cst_13 = arith.constant 1.000000e+00 : f32
    %14 = vector.broadcast %cst_13 : f32 to vector<1x32xf32>
    %15 = arith.addf %14, %13 : vector<1x32xf32>
    %16 = arith.divf %14, %15 : vector<1x32xf32>
    %c0_14 = arith.constant 0 : index
    %c0_15 = arith.constant 0 : index
    %c0_16 = arith.constant 0 : index
    %17 = vector.load %arg1[%c0_14, %c0_15, %c0_16] : memref<1x32x256xf32, #tpu.memory_space<vmem>>, vector<1x32x256xf32>
    %18 = vector.shape_cast %16 : vector<1x32xf32> to vector<1x32x1xf32>
    %19 = vector.broadcast %18 : vector<1x32x1xf32> to vector<1x32x256xf32>
    %20 = arith.mulf %17, %19 : vector<1x32x256xf32>
    %c0_17 = arith.constant 0 : index
    %c0_18 = arith.constant 0 : index
    %c0_19 = arith.constant 0 : index
    %21 = vector.load %arg6[%c0_17, %c0_18, %c0_19] : memref<1x32x256xf32, #tpu.memory_space<vmem>>, vector<1x32x256xf32>
    tpu.vector_store %arg6[%c0_17, %c0_18, %c0_19], %20 {strides = array<i32>} : memref<1x32x256xf32, #tpu.memory_space<vmem>>, vector<1x32x256xf32>,
    return
  }
  func.func @transform_0(%arg0: i32) -> (i32, i32, i32) {
    %c0_i32 = arith.constant 0 : i32
    %c0_i32_0 = arith.constant 0 : i32
    %c0_i32_1 = arith.constant 0 : i32
    return %arg0, %c0_i32, %c0_i32_0 : i32, i32, i32
  }
  func.func @transform_1(%arg0: i32) -> (i32, i32) {
    %c0_i32 = arith.constant 0 : i32
    %c0_i32_0 = arith.constant 0 : i32
    %c0_i32_1 = arith.constant 0 : i32
    return %c0_i32, %c0_i32_0 : i32, i32
  }
  func.func @transform_2(%arg0: i32) -> (i32, i32) {
    %c0_i32 = arith.constant 0 : i32
    %c0_i32_0 = arith.constant 0 : i32
    %c0_i32_1 = arith.constant 0 : i32
    return %c0_i32, %c0_i32_0 : i32, i32
  }
  func.func @transform_3(%arg0: i32) -> (i32, i32) {
    %c0_i32 = arith.constant 0 : i32
    %c0_i32_0 = arith.constant 0 : i32
    %c0_i32_1 = arith.constant 0 : i32
    return %c0_i32, %c0_i32_0 : i32, i32
  }
  func.func @transform_4(%arg0: i32) -> (i32, i32) {
    %c0_i32 = arith.constant 0 : i32
    %c0_i32_0 = arith.constant 0 : i32
    %c0_i32_1 = arith.constant 0 : i32
    return %c0_i32, %c0_i32_0 : i32, i32
  }
  func.func @transform_5(%arg0: i32) -> (i32, i32, i32) {
    %c0_i32 = arith.constant 0 : i32
    %c0_i32_0 = arith.constant 0 : i32
    %c0_i32_1 = arith.constant 0 : i32
    return %arg0, %c0_i32, %c0_i32_0 : i32, i32, i32
  }
}

module attributes {stable_mosaic.version = 11 : i64} {
  func.func @se_kernel(%arg0: i32, %arg1: memref<1x32x256xf32, #tpu.memory_space<vmem>>, %arg2: memref<32x2xf32, #tpu.memory_space<vmem>>, %arg3: memref<1x2xf32, #tpu.memory_space<vmem>>, %arg4: memref<2x32xf32, #tpu.memory_space<vmem>>, %arg5: memref<1x32xf32, #tpu.memory_space<vmem>>, %arg6: memref<1x32x256xf32, #tpu.memory_space<vmem>>) attributes {dimension_semantics = [#tpu.dimension_semantics<parallel>], iteration_bounds = array<i64: 2>, scalar_prefetch = 0 : i64, scratch_operands = 0 : i64, tpu.core_type = #tpu.core_type<tc>, window_params = [{transform_indices = @transform_0, window_bounds = array<i64: 1, 32, 256>}, {pipeline_mode = #tpu.pipeline_mode<synchronous>, transform_indices = @transform_1, window_bounds = array<i64: 32, 2>}, {pipeline_mode = #tpu.pipeline_mode<synchronous>, transform_indices = @transform_2, window_bounds = array<i64: 1, 2>}, {pipeline_mode = #tpu.pipeline_mode<synchronous>, transform_indices = @transform_3, window_bounds = array<i64: 2, 32>}, {pipeline_mode = #tpu.pipeline_mode<synchronous>, transform_indices = @transform_4, window_bounds = array<i64: 1, 32>}, {transform_indices = @transform_5, window_bounds = array<i64: 1, 32, 256>}]} {
    %c0 = arith.constant 0 : index
    %c0_0 = arith.constant 0 : index
    %c0_1 = arith.constant 0 : index
    %0 = vector.load %arg1[%c0, %c0_0, %c0_1] : memref<1x32x256xf32, #tpu.memory_space<vmem>>, vector<1x32x256xf32>
    %cst = arith.constant dense<0.000000e+00> : vector<1x32xf32>
    %1 = vector.multi_reduction <add>, %0, %cst [2] : vector<1x32x256xf32> to vector<1x32xf32>
    %c0_2 = arith.constant 0 : index
    %c0_3 = arith.constant 0 : index
    %2 = vector.load %arg2[%c0_2, %c0_3] : memref<32x2xf32, #tpu.memory_space<vmem>>, vector<32x2xf32>
    %cst_4 = arith.constant dense<0.000000e+00> : vector<1x2xf32>
    %3 = tpu.matmul %1, %2, %cst_4 {dimension_numbers = #tpu.dot_dimension_numbers<[1], [0], [0], [1], [0, 0, 1, 1], [], []>} : vector<1x32xf32>, vector<32x2xf32>, vector<1x2xf32> -> vector<1x2xf32>
    %c0_5 = arith.constant 0 : index
    %c0_6 = arith.constant 0 : index
    %4 = vector.load %arg3[%c0_5, %c0_6] : memref<1x2xf32, #tpu.memory_space<vmem>>, vector<1x2xf32>
    %5 = arith.addf %3, %4 : vector<1x2xf32>
    %cst_7 = arith.constant 0.000000e+00 : f32
    %6 = vector.broadcast %cst_7 : f32 to vector<1x2xf32>
    %7 = arith.maximumf %5, %6 : vector<1x2xf32>
    %c0_8 = arith.constant 0 : index
    %c0_9 = arith.constant 0 : index
    %8 = vector.load %arg4[%c0_8, %c0_9] : memref<2x32xf32, #tpu.memory_space<vmem>>, vector<2x32xf32>
    %cst_10 = arith.constant dense<0.000000e+00> : vector<1x32xf32>
    %9 = tpu.matmul %7, %8, %cst_10 {dimension_numbers = #tpu.dot_dimension_numbers<[1], [0], [0], [1], [0, 0, 1, 1], [], []>} : vector<1x2xf32>, vector<2x32xf32>, vector<1x32xf32> -> vector<1x32xf32>
    %c0_11 = arith.constant 0 : index
    %c0_12 = arith.constant 0 : index
    %10 = vector.load %arg5[%c0_11, %c0_12] : memref<1x32xf32, #tpu.memory_space<vmem>>, vector<1x32xf32>
    %11 = arith.addf %9, %10 : vector<1x32xf32>
    %12 = arith.negf %11 : vector<1x32xf32>
    %13 = math.exp %12 : vector<1x32xf32>
    %cst_13 = arith.constant 1.000000e+00 : f32
    %14 = vector.broadcast %cst_13 : f32 to vector<1x32xf32>
    %15 = arith.addf %14, %13 : vector<1x32xf32>
    %16 = arith.divf %14, %15 : vector<1x32xf32>
    %c0_14 = arith.constant 0 : index
    %c0_15 = arith.constant 0 : index
    %c0_16 = arith.constant 0 : index
    %17 = vector.load %arg1[%c0_14, %c0_15, %c0_16] : memref<1x32x256xf32, #tpu.memory_space<vmem>>, vector<1x32x256xf32>
    %18 = vector.shape_cast %16 : vector<1x32xf32> to vector<1x32x1xf32>
    %19 = vector.broadcast %18 : vector<1x32x1xf32> to vector<1x32x256xf32>
    %20 = arith.mulf %17, %19 : vector<1x32x256xf32>
    %c0_17 = arith.constant 0 : index
    %c0_18 = arith.constant 0 : index
    %c0_19 = arith.constant 0 : index
    %21 = vector.load %arg6[%c0_17, %c0_18, %c0_19] : memref<1x32x256xf32, #tpu.memory_space<vmem>>, vector<1x32x256xf32>
    tpu.vector_store %arg6[%c0_17, %c0_18, %c0_19], %20 {strides = array<i32>} : memref<1x32x256xf32, #tpu.memory_space<vmem>>, vector<1x32x256xf32>,
    return
  }
  func.func @transform_0(%arg0: i32) -> (i32, i32, i32) {
    %c0_i32 = arith.constant 0 : i32
    %c0_i32_0 = arith.constant 0 : i32
    %c0_i32_1 = arith.constant 0 : i32
    return %arg0, %c0_i32, %c0_i32_0 : i32, i32, i32
  }
  func.func @transform_1(%arg0: i32) -> (i32, i32) {
    %c0_i32 = arith.constant 0 : i32
    %c0_i32_0 = arith.constant 0 : i32
    %c0_i32_1 = arith.constant 0 : i32
    return %c0_i32, %c0_i32_0 : i32, i32
  }
  func.func @transform_2(%arg0: i32) -> (i32, i32) {
    %c0_i32 = arith.constant 0 : i32
    %c0_i32_0 = arith.constant 0 : i32
    %c0_i32_1 = arith.constant 0 : i32
    return %c0_i32, %c0_i32_0 : i32, i32
  }
  func.func @transform_3(%arg0: i32) -> (i32, i32) {
    %c0_i32 = arith.constant 0 : i32
    %c0_i32_0 = arith.constant 0 : i32
    %c0_i32_1 = arith.constant 0 : i32
    return %c0_i32, %c0_i32_0 : i32, i32
  }
  func.func @transform_4(%arg0: i32) -> (i32, i32) {
    %c0_i32 = arith.constant 0 : i32
    %c0_i32_0 = arith.constant 0 : i32
    %c0_i32_1 = arith.constant 0 : i32
    return %c0_i32, %c0_i32_0 : i32, i32
  }
  func.func @transform_5(%arg0: i32) -> (i32, i32, i32) {
    %c0_i32 = arith.constant 0 : i32
    %c0_i32_0 = arith.constant 0 : i32
    %c0_i32_1 = arith.constant 0 : i32
    return %arg0, %c0_i32, %c0_i32_0 : i32, i32, i32
  }
}

</mosaic_0001>

<bundles_post_ra>
// kernel: tpu_custom_call.1
= control target key start
LH: loop header
LB: loop body
LE: loop exit
PB: predicated region body
PF: predicated region fallthrough
CT: control target
= control target key end

     0   :  { %10 = vsyncpa [#allocation3], 0  ;;  %s887_s0 = inlined_call_operand.hbm [shape: f32[2,32,256], index: 0, kind: input, shape index: {}]   ;;  %s888_s1 = inlined_call_operand.vmem [shape: f32[32,2], index: 1, kind: input, shape index: {}]   ;;  %s889_s2 = inlined_call_operand.vmem [shape: f32[1,2], index: 2, kind: input, shape index: {}]   ;;  %s890_s3 = inlined_call_operand.vmem [shape: f32[2,32], index: 3, kind: input, shape index: {}]   ;;  %s891_s4 = inlined_call_operand.vmem [shape: f32[1,32], index: 4, kind: input, shape index: {}]   ;;  %s892_s5 = inlined_call_operand.hbm [shape: f32[2,32,256], index: 5, kind: output, shape index: {}]  }
   0x1   :  { %12 = vsyncpa [#allocation3 + $0x1], 0 }
   0x2   :  { %13 = vsyncpa [#allocation4], 0 }
   0x3   :  { %15 = vsyncpa [#allocation4 + $0x1], 0  ;;  %s703_s18 = smov 0   ;;  %s705_s19 = smov 0  }
   0x4   :  { %s707_s20 = smov 0   ;;  %s709_s21 = smov 0  }
   0x5 LB: > { %s724_s22 = sadd.s32 4294967295, %s667_s21   ;;  %s492_s23 = sadd.s32 4294967294, %s667_s21   ;;  %s667_s21 = sphi %s709_s21, %s902_s21   ;;  %s663_s20 = sphi %s707_s20, %s901_s20   ;;  %s659_s19 = sphi %s705_s19, %s900_s19   ;;  %s655_s18 = sphi %s703_s18, %s899_s18  }
   0x6   : > { %s728_s24 = sadd.s32 1, %s667_s21   ;;  %s28_s25 = sadd.s32 1, %s663_s20 }
   0x7   : > { %s25_s26 = ssub.s32 %s667_s21, %s728_s24  ;;  %p35_p0 = scmp.ne.s32.totalorder %s663_s20, %s659_s19 }
   0x8   : > { %p26_p1 = scmp.eq.s32.totalorder %s25_s26, 0  ;;  %p36_p2 = scmp.eq.s32.totalorder %s667_s21, 0 }
   0x9   : > { %p41_p3 = scmp.ne.s32.totalorder %s659_s19, %s655_s18  ;;  %p42_p4 = scmp.eq.s32.totalorder %s724_s22, 0 }
   0xa   : > { %s740_s27 = scalar_select %p26_p1, %s663_s20, %s28_s25  }
   0xb   : > { %p742_p5 = por %p36_p2, %p35_p0  ;;  %p746_p6 = por %p42_p4, %p41_p3 }
   0xc   : > { %p149_p7 = scmp.eq.s32.totalorder %s724_s22, 1  ;;  %p155_p8 = scmp.eq.s32.totalorder %s492_s23, 1 }
   0xd   : > { %p524_p10 = scmp.lt.s32.totalorder %s667_s21, 2  ;;  %s187_s7 = sand.u32 1, %s663_s20  }
   0xe   : > { %p753_p11 = por %p149_p7, %p35_p0  ;;  %p757_p12 = por %p155_p8, %p41_p3 }
   0xf   : > { %s510_s8 = sshll.u32 %s667_s21, 6  ;;  %s495_s9 = sshll.u32 %s187_s7, 6 }
  0x10   : > { %s196_s12 = scalar_lea.hbm %s887_s0, %s510_s8  ;;  %s191_s14 = scalar_lea.vmem [#allocation2], %s495_s9 }
  0x11   : > { %s197_s13 = sshll.u32 %s196_s12, 4  ;;  %s199_s15 = sshll.u32 %s191_s14, 4  ;;  %s198_s13 = int_to_ptr.hbm [resolvable:$true] %s197_s13  ;;  %s200_s15 = int_to_ptr.vmem [resolvable:$true] %s199_s15 }
  0x12   : > { %p768_p13 = pnand %p524_p10, %p742_p5  ;;  %p498_p0 = scmp.ge.s32.totalorder %s667_s21, 1 }
  0x13   : > { %p207_p1 = scmp.lt.s32.totalorder %s667_s21, 3  ;;  %s188_s17 = scalar_lea.sflag [#allocation3], %s187_s7 }
  0x14   : > { %s571_s23 = sshra.s32 %s198_s13, 4  ;;  %p575_p3 = pneg %p768_p13  ;;  %s572_s23 = int_to_ptr.hbm [resolvable:$true] %s571_s23 }
  0x15   : > { %s573_s25 = scalar_lea.hbm %s572_s23, 64  ;;  %s578_s28 = scalar_lea.hbm %s887_s0, 128 }
  0x16   : > { %p574_p2 = scmp.ne.s32.totalorder %s572_s23, %s573_s25  ;;  %p579_p5 = scmp.lt.s32.totalorder %s572_s23, %s887_s0 }
  0x17   : > { %p580_p8 = scmp.lt.s32.totalorder %s578_s28, %s573_s25 }
  0x18   : > { %p576_p4 = pnand %p575_p3, %p574_p2 }
  0x19   : > { %p581_p10 = por %p580_p8, %p579_p5 }
  0x1a   : > { %p577_p7 = pneg %p576_p4 }
  0x1c   : > { %p582_p9 = pnand %p581_p10, %p577_p7 }
  0x1e   : > { %585 = shalt.err (!%p582_p9)
}
  0x1f   : > { %s669_s7 = smov 256   ;;  %s670_s11 = smov 16  }
  0x20   : > { %519 = dma.hbm_to_vmem [thread:$0]  (!%p768_p13), %s198_s13, 1024, %s200_s15, %s188_s17, %s669_s7, %s669_s7, %s670_s11  }
  0x21   : > { %p208_p2 = pnand %p498_p0, %p207_p1 }
  0x22   : > { %s789_s12 = sand.u32 (!%p208_p2), 1, %s659_s19  }
  0x23   : > { %211 = sbr.rel (%p208_p2) target bundleno = 585 (0x249), region = 40  ;;  %s499_s14 = sshll.u32 (!%p208_p2), %s789_s12, 6 }
  0x24   : > { %s214_s23 = scalar_lea.sflag (!%p208_p2), [#allocation3], %s789_s12  ;;  %s217_s25 = scalar_lea.vmem (!%p208_p2), [#allocation2], %s499_s14 }
  0x28   : > { %646 = dma.done.wait (%p746_p6), %s214_s23, 1024  }
  0x29   : > { %648 = vsyncadd (%p746_p6), %s214_s23, 4294966272  ;;  %v799_v0 = vld [vmem:[%s217_s25] sm:$0xff]  ;;  %v801_v1 = vld [vmem:[%s217_s25 + $0x8] sm:$0xff]  ;;  %v274_v16 = vlaneseq  ;;  %vm279_vm0 = vcmask 130112   ;;  %vm283_vm1 = vcmask 195712   ;;  %vm287_vm2 = vcmask 261312  }
  0x2a   : > { %v803_v2 = vld [vmem:[%s217_s25 + $0x20] sm:$0xff]  ;;  %v253_v3 = vadd.f32 %v801_v1, %v799_v0  ;;  %v807_v4 = vld [vmem:[%s217_s25 + $0x28] sm:$0xff]  ;;  %v811_v6 = vld [vmem:[%s217_s25 + $0x10] sm:$0xff]  ;;  %vm289_vm3 = vcmask 261120   ;;  %vm319_vm4 = vcmask 1041408   ;;  %vm315_vm5 = vcmask 15360  }
  0x2b   : > { %v259_v5 = vadd.f32 %v807_v4, %v803_v2  ;;  %v813_v7 = vld [vmem:[%s217_s25 + $0x18] sm:$0xff]  ;;  %v815_v8 = vld [vmem:[%s217_s25 + $0x30] sm:$0xff]  ;;  %v266_v14 = vld [vmem:[%s888_s1 + $0x8] sm:$0xff]  ;;  %v275_v19 = vand.u32 127, %v274_v16  ;;  %v364_v37 = vshrl.u32 %v274_v16, 7  ;;  %s244_s29 = scalar_lea.vmem [#allocation5], %s499_s14 }
  0x2c   : > { %254 = vadd.xlane.f32.xlu0 %v253_v3  ;;  %v817_v9 = vld [vmem:[%s217_s25 + $0x38] sm:$0xff]  ;;  %v256_v10 = vadd.f32 %v813_v7, %v811_v6  ;;  %v267_v13 = vld [vmem:[%s888_s1 + $0x10] sm:$0xff]  ;;  %v265_v15 = vld [vmem:[%s888_s1] sm:$0xff]  ;;  %s511_s13 = sshll.u32 %s724_s22, 6  ;;  %s416_s26 = sshll.u32 %s244_s29, 4  ;;  %s417_s26 = int_to_ptr.vmem [resolvable:$true] %s416_s26 }
  0x2d   : > { %260 = vadd.xlane.f32.xlu1 %v259_v5  ;;  %v262_v11 = vadd.f32 %v817_v9, %v815_v8  ;;  %v268_v12 = vld [vmem:[%s888_s1 + $0x18] sm:$0xff]  ;;  %v277_v20 = vadd.s32 4294967288, %v275_v19  ;;  %v281_v21 = vadd.s32 4294967280, %v275_v19  ;;  %v285_v22 = vadd.s32 4294967272, %v275_v19  ;;  %v313_v32 = vld [vmem:[%s890_s3] sm:$0x3]  ;;  %562 = vset.pattern.permute.xlu2 %v364_v37  ;;  %s415_s17 = scalar_lea.hbm %s892_s5, %s511_s13 }
  0x2e   : > { %304 = vmatpush.msra.mxu0 %v268_v12  ;;  %502 = vmatpush.msk.msra.mxu1 %vm319_vm4, %v313_v32  ;;  %v269_v33 = vld [vmem:[%s889_s2] sm:$0x1]  ;;  %v383_v38 = vadd.s32 24, %v364_v37  ;;  %v377_v39 = vadd.s32 16, %v364_v37  ;;  %v371_v57 = vadd.s32 8, %v364_v37  ;;  %s418_s8 = sshll.u32 %s415_s17, 4  ;;  %s419_s8 = int_to_ptr.hbm [resolvable:$true] %s418_s8 }
  0x2f   : > { %v314_v40 = vld [vmem:[%s891_s4] sm:$0x1]  ;;  %s404_s22 = scalar_lea.sflag [#allocation4], %s789_s12  ;;  %s615_s14 = sshra.s32 %s419_s8, 4  ;;  %s616_s14 = int_to_ptr.hbm [resolvable:$true] %s615_s14 }
  0x30   : > { %305 = vmatpush.msra.mxu0 %v267_v13  ;;  %565 = vset.pattern.permute.xlu1 %v383_v38  ;;  %s617_s28 = scalar_lea.hbm %s616_s14, 64  ;;  %s621_s7 = scalar_lea.hbm %s892_s5, 128 }
  0x31   : > { %564 = vset.pattern.permute.xlu0 %v377_v39  ;;  %p618_p6 = scmp.ne.s32.totalorder %s616_s14, %s617_s28  ;;  %p622_p0 = scmp.lt.s32.totalorder %s616_s14, %s892_s5 }
  0x32   : > { %306 = vmatpush.msra.mxu0 %v266_v14  ;;  %p623_p1 = scmp.lt.s32.totalorder %s621_s7, %s617_s28 }
  0x33   : > { %p619_p9 = pnand %p618_p6, %p753_p11 }
  0x34   : > { %257 = vadd.xlane.f32.xlu0 %v256_v10  ;;  %307 = vmatpush.msra.mxu0 %v265_v15  ;;  %p624_p3 = por %p623_p1, %p622_p0 }
  0x35   : > { %263 = vadd.xlane.f32.xlu1 %v262_v11  ;;  %p620_p13 = pneg %p619_p9 }
  0x37   : > { %p625_p4 = pnand %p624_p3, %p620_p13 }
  0x9f   : > { %v255_v17 = vpop.xlane.xlu0 %254 }
  0xa0   : > { %v261_v18 = vpop.xlane.xlu1 %260  ;;  %v276_v24 = vperm.slane %v255_v17, %v275_v19 }
  0xa1   : > { %v282_v27 = vperm.slane %v261_v18, %v281_v21 }
  0xa7   : > { %v258_v23 = vpop.xlane.xlu0 %257 }
  0xa8   : > { %v278_v25 = vperm.slane %v258_v23, %v277_v20  ;;  %v264_v26 = vpop.xlane.xlu1 %263 }
  0xa9   : > { %v286_v28 = vperm.slane %v264_v26, %v285_v22 }
  0xaa   : > { %v280_v29 = vsel %vm279_vm0, %v278_v25, %v276_v24 }
  0xab   : > { %v284_v30 = vsel %vm283_vm1, %v282_v27, %v280_v29 }
  0xac   : > { %v288_v31 = vsel %vm287_vm2, %v286_v28, %v284_v30 }
  0xad   : > { %501 = vmatmul.msk.f32.vlgmr.msra.gmra.mxu0 %vm289_vm3, %v288_v31 }
 0x12a   : > { %v309_v34 = vpop.f32.mrf.mxu0 }
 0x12b   : > { %v310_v35 = vadd.f32 %v309_v34, %v269_v33 }
 0x12d   : > { %v312_v36 = vmax.f32 %v310_v35, 0.0 }
 0x12f   : > { %503 = vmatmul.msk.f32.vlgmr.msra.gmra.mxu1 %vm315_vm5, %v312_v36 }
 0x1ac   : > { %v340_v41 = vpop.f32.mrf.mxu1 }
 0x1ad   : > { %v341_v42 = vadd.f32 %v340_v41, %v314_v40 }
 0x1af   : > { %v504_v43 = vmul.f32 -1.442695, %v341_v42 }
 0x1b1   : > { %567 = vpow2.f32 %v504_v43 }
 0x1b7   : > { %v568_v44 = vpop.eup %567 }
 0x1b8   : > { %v346_v45 = vadd.f32 1.0, %v568_v44 }
 0x1ba   : > { %569 = vrcp.f32 %v346_v45  ;;  %v358_v49 = vand.u32 2147483648, %v346_v45  ;;  %v356_v51 = vand.u32 2147483647, %v346_v45  ;;  %vm352_vm7 = vweird.f32 %v346_v45 }
 0x1bc   : > { %v359_v53 = vor.u32 1.1754944e-38, %v358_v49  ;;  %vm357_vm9 = vcmp.eq.f32.partialorder %v356_v51, 8.507059e+37 }
 0x1c0   : > { %v570_v46 = vpop.eup %569 }
 0x1c1   : > { %v348_v47 = vmul.f32 %v570_v46, %v346_v45  ;;  %vm353_vm6 = vweird.f32 %v570_v46 }
 0x1c2   : > { %vm354_vm8 = vmor %vm352_vm7, %vm353_vm6 }
 0x1c3   : > { %v349_v48 = vsub.f32 1.0, %v348_v47 }
 0x1c5   : > { %v350_v50 = vmul.f32 %v570_v46, %v349_v48 }
 0x1c7   : > { %v351_v52 = vadd.f32 %v570_v46, %v350_v50 }
 0x1c9   : > { %v355_v54 = vsel %vm354_vm8, %v570_v46, %v351_v52 }
 0x1ca   : > { %v360_v55 = vsel %vm357_vm9, %v359_v53, %v355_v54 }
 0x1cb   : > { %v362_v56 = vperm.slane %v360_v55, 0 }
 0x1cd   : > { %385 = vperm.xlu1 %565, %v362_v56   ;;  %379 = vperm.xlu0 %564, %v362_v56  }
 0x1ce   : > { %367 = vperm.xlu2 %562, %v362_v56  }
 0x1d5   : > { %566 = vset.pattern.permute.xlu0 %v383_v38 }
 0x1d6   : > { %563 = vset.pattern.permute.xlu2 %v371_v57 }
 0x1de   : > { %373 = vperm.xlu2 %563, %v362_v56  }
 0x228   : > { %v368_v58 = vpop.permute.xlu2 %367 }
 0x229   : > { %v387_v59 = vmul.f32 %v368_v58, %v799_v0  ;;  %v388_v60 = vmul.f32 %v368_v58, %v801_v1 }
 0x22b   : > { %395 = vst [vmem:[%s244_s29] sm:$0xff] %v387_v59 }
 0x22c   : > { %396 = vst [vmem:[%s244_s29 + $0x8] sm:$0xff] %v388_v60 }
 0x238   : > { %v374_v61 = vpop.permute.xlu2 %373 }
 0x239   : > { %v389_v62 = vmul.f32 %v374_v61, %v811_v6  ;;  %v390_v63 = vmul.f32 %v374_v61, %v813_v7 }
 0x23b   : > { %397 = vst [vmem:[%s244_s29 + $0x10] sm:$0xff] %v389_v62 }
 0x23c   : > { %398 = vst [vmem:[%s244_s29 + $0x18] sm:$0xff] %v390_v63 }
 0x23f   : > { %v386_v0 = vpop.permute.xlu1 %385  ;;  %v380_v1 = vpop.permute.xlu0 %379 }
 0x240   : > { %v393_v3 = vmul.f32 %v386_v0, %v815_v8  ;;  %v394_v5 = vmul.f32 %v386_v0, %v817_v9  ;;  %v391_v6 = vmul.f32 %v380_v1, %v803_v2  ;;  %v392_v7 = vmul.f32 %v380_v1, %v807_v4 }
 0x242   : > { %401 = vst [vmem:[%s244_s29 + $0x30] sm:$0xff] %v393_v3 }
 0x243   : > { %402 = vst [vmem:[%s244_s29 + $0x38] sm:$0xff] %v394_v5 }
 0x244   : > { %399 = vst [vmem:[%s244_s29 + $0x20] sm:$0xff] %v391_v6 }
 0x245   : > { %400 = vst [vmem:[%s244_s29 + $0x28] sm:$0xff] %v392_v7 }
 0x246   : > { %628 = shalt.err (!%p625_p4)
}
 0x247   : > { %s671_s12 = smov 256   ;;  %s672_s25 = smov 16  }
 0x248   : > { %514 = dma.vmem_to_hbm [thread:$0]  (%p753_p11), %s417_s26, 1024, %s419_s8, %s404_s22, %s671_s12, %s671_s12, %s672_s25  }
 0x249 PF: > { %s433_s29 = sand.u32 1, %s655_s18   ;;  %p898_p7 = scmp.ge.s32.totalorder %s667_s21, 2 }
 0x24a   : > { %s434_s13 = scalar_lea.sflag [#allocation4], %s433_s29 }
 0x24b   : > { %p521_p5 = pnand %p898_p7, %p757_p12 }
 0x24d   : > { %p522_p8 = pneg %p521_p5 }
 0x24f   : > { %650 = dma.done.wait (%p522_p8), %s434_s13, 1024  }
 0x250   : > { %652 = vsyncadd (%p522_p8), %s434_s13, 4294966272  ;;  %p18_p10 = scmp.ge.s32.totalorder %s728_s24, 4   ;;  %s899_s18 = smov %s659_s19 }
 0x251   : > { %s900_s19 = smov %s663_s20  ;;  %s901_s20 = smov %s740_s27 }
 0x252   : > { %s902_s21 = smov %s728_s24  ;;  %20 = sbr.rel (!%p18_p10) target bundleno = 5 (0x5), region = 85 }
 0x257   :  { %440 = vsyncpa [#allocation3], 1 }
 0x258   :  { %442 = vsyncpa [#allocation3 + $0x1], 1 }
 0x259   :  { %443 = vsyncpa [#allocation4], 1 }
 0x25a   :  { %445 = vsyncpa [#allocation4 + $0x1], 1 }

// kernel: tpu_custom_call.1
= control target key start
LH: loop header
LB: loop body
LE: loop exit
PB: predicated region body
PF: predicated region fallthrough
CT: control target
= control target key end

     0   :  { %10 = vsyncpa [#allocation3], 0  ;;  %s887_s0 = inlined_call_operand.hbm [shape: f32[2,32,256], index: 0, kind: input, shape index: {}]   ;;  %s888_s1 = inlined_call_operand.vmem [shape: f32[32,2], index: 1, kind: input, shape index: {}]   ;;  %s889_s2 = inlined_call_operand.vmem [shape: f32[1,2], index: 2, kind: input, shape index: {}]   ;;  %s890_s3 = inlined_call_operand.vmem [shape: f32[2,32], index: 3, kind: input, shape index: {}]   ;;  %s891_s4 = inlined_call_operand.vmem [shape: f32[1,32], index: 4, kind: input, shape index: {}]   ;;  %s892_s5 = inlined_call_operand.hbm [shape: f32[2,32,256], index: 5, kind: output, shape index: {}]  }
   0x1   :  { %12 = vsyncpa [#allocation3 + $0x1], 0 }
   0x2   :  { %13 = vsyncpa [#allocation4], 0 }
   0x3   :  { %15 = vsyncpa [#allocation4 + $0x1], 0  ;;  %s703_s18 = smov 0   ;;  %s705_s19 = smov 0  }
   0x4   :  { %s707_s20 = smov 0   ;;  %s709_s21 = smov 0  }
   0x5 LB: > { %s724_s22 = sadd.s32 4294967295, %s667_s21   ;;  %s492_s23 = sadd.s32 4294967294, %s667_s21   ;;  %s667_s21 = sphi %s709_s21, %s902_s21   ;;  %s663_s20 = sphi %s707_s20, %s901_s20   ;;  %s659_s19 = sphi %s705_s19, %s900_s19   ;;  %s655_s18 = sphi %s703_s18, %s899_s18  }
   0x6   : > { %s728_s24 = sadd.s32 1, %s667_s21   ;;  %s28_s25 = sadd.s32 1, %s663_s20 }
   0x7   : > { %s25_s26 = ssub.s32 %s667_s21, %s728_s24  ;;  %p35_p0 = scmp.ne.s32.totalorder %s663_s20, %s659_s19 }
   0x8   : > { %p26_p1 = scmp.eq.s32.totalorder %s25_s26, 0  ;;  %p36_p2 = scmp.eq.s32.totalorder %s667_s21, 0 }
   0x9   : > { %p41_p3 = scmp.ne.s32.totalorder %s659_s19, %s655_s18  ;;  %p42_p4 = scmp.eq.s32.totalorder %s724_s22, 0 }
   0xa   : > { %s740_s27 = scalar_select %p26_p1, %s663_s20, %s28_s25  }
   0xb   : > { %p742_p5 = por %p36_p2, %p35_p0  ;;  %p746_p6 = por %p42_p4, %p41_p3 }
   0xc   : > { %p149_p7 = scmp.eq.s32.totalorder %s724_s22, 1  ;;  %p155_p8 = scmp.eq.s32.totalorder %s492_s23, 1 }
   0xd   : > { %p524_p10 = scmp.lt.s32.totalorder %s667_s21, 2  ;;  %s187_s7 = sand.u32 1, %s663_s20  }
   0xe   : > { %p753_p11 = por %p149_p7, %p35_p0  ;;  %p757_p12 = por %p155_p8, %p41_p3 }
   0xf   : > { %s510_s8 = sshll.u32 %s667_s21, 6  ;;  %s495_s9 = sshll.u32 %s187_s7, 6 }
  0x10   : > { %s196_s12 = scalar_lea.hbm %s887_s0, %s510_s8  ;;  %s191_s14 = scalar_lea.vmem [#allocation2], %s495_s9 }
  0x11   : > { %s197_s13 = sshll.u32 %s196_s12, 4  ;;  %s199_s15 = sshll.u32 %s191_s14, 4  ;;  %s198_s13 = int_to_ptr.hbm [resolvable:$true] %s197_s13  ;;  %s200_s15 = int_to_ptr.vmem [resolvable:$true] %s199_s15 }
  0x12   : > { %p768_p13 = pnand %p524_p10, %p742_p5  ;;  %p498_p0 = scmp.ge.s32.totalorder %s667_s21, 1 }
  0x13   : > { %p207_p1 = scmp.lt.s32.totalorder %s667_s21, 3  ;;  %s188_s17 = scalar_lea.sflag [#allocation3], %s187_s7 }
  0x14   : > { %s571_s23 = sshra.s32 %s198_s13, 4  ;;  %p575_p3 = pneg %p768_p13  ;;  %s572_s23 = int_to_ptr.hbm [resolvable:$true] %s571_s23 }
  0x15   : > { %s573_s25 = scalar_lea.hbm %s572_s23, 64  ;;  %s578_s28 = scalar_lea.hbm %s887_s0, 128 }
  0x16   : > { %p574_p2 = scmp.ne.s32.totalorder %s572_s23, %s573_s25  ;;  %p579_p5 = scmp.lt.s32.totalorder %s572_s23, %s887_s0 }
  0x17   : > { %p580_p8 = scmp.lt.s32.totalorder %s578_s28, %s573_s25 }
  0x18   : > { %p576_p4 = pnand %p575_p3, %p574_p2 }
  0x19   : > { %p581_p10 = por %p580_p8, %p579_p5 }
  0x1a   : > { %p577_p7 = pneg %p576_p4 }
  0x1c   : > { %p582_p9 = pnand %p581_p10, %p577_p7 }
  0x1e   : > { %585 = shalt.err (!%p582_p9)
}
  0x1f   : > { %s669_s7 = smov 256   ;;  %s670_s11 = smov 16  }
  0x20   : > { %519 = dma.hbm_to_vmem [thread:$0]  (!%p768_p13), %s198_s13, 1024, %s200_s15, %s188_s17, %s669_s7, %s669_s7, %s670_s11  }
  0x21   : > { %p208_p2 = pnand %p498_p0, %p207_p1 }
  0x22   : > { %s789_s12 = sand.u32 (!%p208_p2), 1, %s659_s19  }
  0x23   : > { %211 = sbr.rel (%p208_p2) target bundleno = 585 (0x249), region = 40  ;;  %s499_s14 = sshll.u32 (!%p208_p2), %s789_s12, 6 }
  0x24   : > { %s214_s23 = scalar_lea.sflag (!%p208_p2), [#allocation3], %s789_s12  ;;  %s217_s25 = scalar_lea.vmem (!%p208_p2), [#allocation2], %s499_s14 }
  0x28   : > { %646 = dma.done.wait (%p746_p6), %s214_s23, 1024  }
  0x29   : > { %648 = vsyncadd (%p746_p6), %s214_s23, 4294966272  ;;  %v799_v0 = vld [vmem:[%s217_s25] sm:$0xff]  ;;  %v801_v1 = vld [vmem:[%s217_s25 + $0x8] sm:$0xff]  ;;  %v274_v16 = vlaneseq  ;;  %vm279_vm0 = vcmask 130112   ;;  %vm283_vm1 = vcmask 195712   ;;  %vm287_vm2 = vcmask 261312  }
  0x2a   : > { %v803_v2 = vld [vmem:[%s217_s25 + $0x20] sm:$0xff]  ;;  %v253_v3 = vadd.f32 %v801_v1, %v799_v0  ;;  %v807_v4 = vld [vmem:[%s217_s25 + $0x28] sm:$0xff]  ;;  %v811_v6 = vld [vmem:[%s217_s25 + $0x10] sm:$0xff]  ;;  %vm289_vm3 = vcmask 261120   ;;  %vm319_vm4 = vcmask 1041408   ;;  %vm315_vm5 = vcmask 15360  }
  0x2b   : > { %v259_v5 = vadd.f32 %v807_v4, %v803_v2  ;;  %v813_v7 = vld [vmem:[%s217_s25 + $0x18] sm:$0xff]  ;;  %v815_v8 = vld [vmem:[%s217_s25 + $0x30] sm:$0xff]  ;;  %v266_v14 = vld [vmem:[%s888_s1 + $0x8] sm:$0xff]  ;;  %v275_v19 = vand.u32 127, %v274_v16  ;;  %v364_v37 = vshrl.u32 %v274_v16, 7  ;;  %s244_s29 = scalar_lea.vmem [#allocation5], %s499_s14 }
  0x2c   : > { %254 = vadd.xlane.f32.xlu0 %v253_v3  ;;  %v817_v9 = vld [vmem:[%s217_s25 + $0x38] sm:$0xff]  ;;  %v256_v10 = vadd.f32 %v813_v7, %v811_v6  ;;  %v267_v13 = vld [vmem:[%s888_s1 + $0x10] sm:$0xff]  ;;  %v265_v15 = vld [vmem:[%s888_s1] sm:$0xff]  ;;  %s511_s13 = sshll.u32 %s724_s22, 6  ;;  %s416_s26 = sshll.u32 %s244_s29, 4  ;;  %s417_s26 = int_to_ptr.vmem [resolvable:$true] %s416_s26 }
  0x2d   : > { %260 = vadd.xlane.f32.xlu1 %v259_v5  ;;  %v262_v11 = vadd.f32 %v817_v9, %v815_v8  ;;  %v268_v12 = vld [vmem:[%s888_s1 + $0x18] sm:$0xff]  ;;  %v277_v20 = vadd.s32 4294967288, %v275_v19  ;;  %v281_v21 = vadd.s32 4294967280, %v275_v19  ;;  %v285_v22 = vadd.s32 4294967272, %v275_v19  ;;  %v313_v32 = vld [vmem:[%s890_s3] sm:$0x3]  ;;  %562 = vset.pattern.permute.xlu2 %v364_v37  ;;  %s415_s17 = scalar_lea.hbm %s892_s5, %s511_s13 }
  0x2e   : > { %304 = vmatpush.msra.mxu0 %v268_v12  ;;  %502 = vmatpush.msk.msra.mxu1 %vm319_vm4, %v313_v32  ;;  %v269_v33 = vld [vmem:[%s889_s2] sm:$0x1]  ;;  %v383_v38 = vadd.s32 24, %v364_v37  ;;  %v377_v39 = vadd.s32 16, %v364_v37  ;;  %v371_v57 = vadd.s32 8, %v364_v37  ;;  %s418_s8 = sshll.u32 %s415_s17, 4  ;;  %s419_s8 = int_to_ptr.hbm [resolvable:$true] %s418_s8 }
  0x2f   : > { %v314_v40 = vld [vmem:[%s891_s4] sm:$0x1]  ;;  %s404_s22 = scalar_lea.sflag [#allocation4], %s789_s12  ;;  %s615_s14 = sshra.s32 %s419_s8, 4  ;;  %s616_s14 = int_to_ptr.hbm [resolvable:$true] %s615_s14 }
  0x30   : > { %305 = vmatpush.msra.mxu0 %v267_v13  ;;  %565 = vset.pattern.permute.xlu1 %v383_v38  ;;  %s617_s28 = scalar_lea.hbm %s616_s14, 64  ;;  %s621_s7 = scalar_lea.hbm %s892_s5, 128 }
  0x31   : > { %564 = vset.pattern.permute.xlu0 %v377_v39  ;;  %p618_p6 = scmp.ne.s32.totalorder %s616_s14, %s617_s28  ;;  %p622_p0 = scmp.lt.s32.totalorder %s616_s14, %s892_s5 }
  0x32   : > { %306 = vmatpush.msra.mxu0 %v266_v14  ;;  %p623_p1 = scmp.lt.s32.totalorder %s621_s7, %s617_s28 }
  0x33   : > { %p619_p9 = pnand %p618_p6, %p753_p11 }
  0x34   : > { %257 = vadd.xlane.f32.xlu0 %v256_v10  ;;  %307 = vmatpush.msra.mxu0 %v265_v15  ;;  %p624_p3 = por %p623_p1, %p622_p0 }
  0x35   : > { %263 = vadd.xlane.f32.xlu1 %v262_v11  ;;  %p620_p13 = pneg %p619_p9 }
  0x37   : > { %p625_p4 = pnand %p624_p3, %p620_p13 }
  0x9f   : > { %v255_v17 = vpop.xlane.xlu0 %254 }
  0xa0   : > { %v261_v18 = vpop.xlane.xlu1 %260  ;;  %v276_v24 = vperm.slane %v255_v17, %v275_v19 }
  0xa1   : > { %v282_v27 = vperm.slane %v261_v18, %v281_v21 }
  0xa7   : > { %v258_v23 = vpop.xlane.xlu0 %257 }
  0xa8   : > { %v278_v25 = vperm.slane %v258_v23, %v277_v20  ;;  %v264_v26 = vpop.xlane.xlu1 %263 }
  0xa9   : > { %v286_v28 = vperm.slane %v264_v26, %v285_v22 }
  0xaa   : > { %v280_v29 = vsel %vm279_vm0, %v278_v25, %v276_v24 }
  0xab   : > { %v284_v30 = vsel %vm283_vm1, %v282_v27, %v280_v29 }
  0xac   : > { %v288_v31 = vsel %vm287_vm2, %v286_v28, %v284_v30 }
  0xad   : > { %501 = vmatmul.msk.f32.vlgmr.msra.gmra.mxu0 %vm289_vm3, %v288_v31 }
 0x12a   : > { %v309_v34 = vpop.f32.mrf.mxu0 }
 0x12b   : > { %v310_v35 = vadd.f32 %v309_v34, %v269_v33 }
 0x12d   : > { %v312_v36 = vmax.f32 %v310_v35, 0.0 }
 0x12f   : > { %503 = vmatmul.msk.f32.vlgmr.msra.gmra.mxu1 %vm315_vm5, %v312_v36 }
 0x1ac   : > { %v340_v41 = vpop.f32.mrf.mxu1 }
 0x1ad   : > { %v341_v42 = vadd.f32 %v340_v41, %v314_v40 }
 0x1af   : > { %v504_v43 = vmul.f32 -1.442695, %v341_v42 }
 0x1b1   : > { %567 = vpow2.f32 %v504_v43 }
 0x1b7   : > { %v568_v44 = vpop.eup %567 }
 0x1b8   : > { %v346_v45 = vadd.f32 1.0, %v568_v44 }
 0x1ba   : > { %569 = vrcp.f32 %v346_v45  ;;  %v358_v49 = vand.u32 2147483648, %v346_v45  ;;  %v356_v51 = vand.u32 2147483647, %v346_v45  ;;  %vm352_vm7 = vweird.f32 %v346_v45 }
 0x1bc   : > { %v359_v53 = vor.u32 1.1754944e-38, %v358_v49  ;;  %vm357_vm9 = vcmp.eq.f32.partialorder %v356_v51, 8.507059e+37 }
 0x1c0   : > { %v570_v46 = vpop.eup %569 }
 0x1c1   : > { %v348_v47 = vmul.f32 %v570_v46, %v346_v45  ;;  %vm353_vm6 = vweird.f32 %v570_v46 }
 0x1c2   : > { %vm354_vm8 = vmor %vm352_vm7, %vm353_vm6 }
 0x1c3   : > { %v349_v48 = vsub.f32 1.0, %v348_v47 }
 0x1c5   : > { %v350_v50 = vmul.f32 %v570_v46, %v349_v48 }
 0x1c7   : > { %v351_v52 = vadd.f32 %v570_v46, %v350_v50 }
 0x1c9   : > { %v355_v54 = vsel %vm354_vm8, %v570_v46, %v351_v52 }
 0x1ca   : > { %v360_v55 = vsel %vm357_vm9, %v359_v53, %v355_v54 }
 0x1cb   : > { %v362_v56 = vperm.slane %v360_v55, 0 }
 0x1cd   : > { %385 = vperm.xlu1 %565, %v362_v56   ;;  %379 = vperm.xlu0 %564, %v362_v56  }
 0x1ce   : > { %367 = vperm.xlu2 %562, %v362_v56  }
 0x1d5   : > { %566 = vset.pattern.permute.xlu0 %v383_v38 }
 0x1d6   : > { %563 = vset.pattern.permute.xlu2 %v371_v57 }
 0x1de   : > { %373 = vperm.xlu2 %563, %v362_v56  }
 0x228   : > { %v368_v58 = vpop.permute.xlu2 %367 }
 0x229   : > { %v387_v59 = vmul.f32 %v368_v58, %v799_v0  ;;  %v388_v60 = vmul.f32 %v368_v58, %v801_v1 }
 0x22b   : > { %395 = vst [vmem:[%s244_s29] sm:$0xff] %v387_v59 }
 0x22c   : > { %396 = vst [vmem:[%s244_s29 + $0x8] sm:$0xff] %v388_v60 }
 0x238   : > { %v374_v61 = vpop.permute.xlu2 %373 }
 0x239   : > { %v389_v62 = vmul.f32 %v374_v61, %v811_v6  ;;  %v390_v63 = vmul.f32 %v374_v61, %v813_v7 }
 0x23b   : > { %397 = vst [vmem:[%s244_s29 + $0x10] sm:$0xff] %v389_v62 }
 0x23c   : > { %398 = vst [vmem:[%s244_s29 + $0x18] sm:$0xff] %v390_v63 }
 0x23f   : > { %v386_v0 = vpop.permute.xlu1 %385  ;;  %v380_v1 = vpop.permute.xlu0 %379 }
 0x240   : > { %v393_v3 = vmul.f32 %v386_v0, %v815_v8  ;;  %v394_v5 = vmul.f32 %v386_v0, %v817_v9  ;;  %v391_v6 = vmul.f32 %v380_v1, %v803_v2  ;;  %v392_v7 = vmul.f32 %v380_v1, %v807_v4 }
 0x242   : > { %401 = vst [vmem:[%s244_s29 + $0x30] sm:$0xff] %v393_v3 }
 0x243   : > { %402 = vst [vmem:[%s244_s29 + $0x38] sm:$0xff] %v394_v5 }
 0x244   : > { %399 = vst [vmem:[%s244_s29 + $0x20] sm:$0xff] %v391_v6 }
 0x245   : > { %400 = vst [vmem:[%s244_s29 + $0x28] sm:$0xff] %v392_v7 }
 0x246   : > { %628 = shalt.err (!%p625_p4)
}
 0x247   : > { %s671_s12 = smov 256   ;;  %s672_s25 = smov 16  }
 0x248   : > { %514 = dma.vmem_to_hbm [thread:$0]  (%p753_p11), %s417_s26, 1024, %s419_s8, %s404_s22, %s671_s12, %s671_s12, %s672_s25  }
 0x249 PF: > { %s433_s29 = sand.u32 1, %s655_s18   ;;  %p898_p7 = scmp.ge.s32.totalorder %s667_s21, 2 }
 0x24a   : > { %s434_s13 = scalar_lea.sflag [#allocation4], %s433_s29 }
 0x24b   : > { %p521_p5 = pnand %p898_p7, %p757_p12 }
 0x24d   : > { %p522_p8 = pneg %p521_p5 }
 0x24f   : > { %650 = dma.done.wait (%p522_p8), %s434_s13, 1024  }
 0x250   : > { %652 = vsyncadd (%p522_p8), %s434_s13, 4294966272  ;;  %p18_p10 = scmp.ge.s32.totalorder %s728_s24, 4   ;;  %s899_s18 = smov %s659_s19 }
 0x251   : > { %s900_s19 = smov %s663_s20  ;;  %s901_s20 = smov %s740_s27 }
 0x252   : > { %s902_s21 = smov %s728_s24  ;;  %20 = sbr.rel (!%p18_p10) target bundleno = 5 (0x5), region = 85 }
 0x257   :  { %440 = vsyncpa [#allocation3], 1 }
 0x258   :  { %442 = vsyncpa [#allocation3 + $0x1], 1 }
 0x259   :  { %443 = vsyncpa [#allocation4], 1 }
 0x25a   :  { %445 = vsyncpa [#allocation4 + $0x1], 1 }

</bundles_post_ra>
